<compile_context>
chip_gen: v7x
topology: tpu7x:2x2x1
jax: 0.10.0
libtpu: 0.0.40
codegen_flags: <defaults>
</compile_context>

<pallas_src>
import functools

import jax
import jax.numpy as jnp
from jax.experimental import pallas as pl
from jax.experimental.pallas import tpu as pltpu

_LANE_COLS = 512        # lane-dense last dim for the scalar path (multiple of 128)
_LANE_SHIFT = 9         # log2(_LANE_COLS); index math uses shifts (no vector int mul)
_MAX_TILE_ROWS = 512    # (512, 512) f32 tile = 1 MiB -> safe with double-buffered in+out
_VEC_TILE_COLS = 8192   # column tile for the (3, N*Cv) vector path (multiple of 128)

_SCALAR_SALT = 0x9E3779B9
_VECTOR_SALT = 0x7F4A7C15


def _round_up(a: int, b: int) -> int:
    return (a + b - 1) // b * b


def _threshold_u32(keep_prob: float) -> int:
    # Strict '<' against this threshold gives P(keep) within ~2e-10 of keep_prob.
    return max(1, min(int(round(keep_prob * 2.0 ** 32)), 2 ** 32 - 1))


def _hash32(x):
    """Bob Jenkins' 32-bit integer hash: shift/add/xor only (VPU friendly, no int mul)."""
    x = (x + jnp.uint32(0x7ED55D16)) + (x << 12)
    x = (x ^ jnp.uint32(0xC761C23C)) ^ (x >> 19)
    x = (x + jnp.uint32(0x165667B1)) + (x << 5)
    x = (x + jnp.uint32(0xD3A2646C)) ^ (x << 9)
    x = (x + jnp.uint32(0xFD7046C5)) + (x << 3)
    x = (x ^ jnp.uint32(0xB55A4F09)) ^ (x >> 16)
    return x


def _scalar_dropout_kernel(seed_ref, x_ref, o_ref, *, threshold, inv_keep, salt, col_shift):
    # Elementwise dropout on a lane-dense (tile_rows, 512) tile of the flattened tensor.
    rows, cols = x_ref.shape
    key = _hash32(seed_ref[0].astype(jnp.uint32) ^ jnp.uint32(salt))
    row0 = (pl.program_id(0) * rows).astype(jnp.uint32)
    r = jax.lax.broadcasted_iota(jnp.int32, (rows, cols), 0).astype(jnp.uint32)
    c = jax.lax.broadcasted_iota(jnp.int32, (rows, cols), 1).astype(jnp.uint32)
    idx = ((row0 + r) << col_shift) + c                 # global flat index (grid-invariant)
    keep = _hash32(idx ^ key) < jnp.uint32(threshold)
    scaled = x_ref[...] * jnp.asarray(inv_keep, dtype=x_ref.dtype)
    o_ref[...] = jnp.where(keep, scaled, jnp.zeros_like(scaled))


def _vector_dropout_kernel(seed_ref, x_ref, o_ref, *, threshold, inv_keep, salt):
    # Vector-channel dropout on a (3, tile_cols) tile of the transposed vector tensor.
    # One mask value per column (= per (node, channel) vector), identical across the
    # 3 coordinate rows -> exact VectorDropout broadcast semantics.
    d, cols = x_ref.shape
    key = _hash32(seed_ref[0].astype(jnp.uint32) ^ jnp.uint32(salt))
    col0 = (pl.program_id(0) * cols).astype(jnp.uint32)
    c = jax.lax.broadcasted_iota(jnp.int32, (d, cols), 1).astype(jnp.uint32)
    idx = col0 + c                                      # same value in every coordinate row
    keep = _hash32(idx ^ key) < jnp.uint32(threshold)
    scaled = x_ref[...] * jnp.asarray(inv_keep, dtype=x_ref.dtype)
    o_ref[...] = jnp.where(keep, scaled, jnp.zeros_like(scaled))


def scalar_dropout(x, drop_rate, seed, training=True):
    """nn.Dropout(drop_rate) equivalent."""
    if (not training) or drop_rate <= 0.0 or x.size == 0:
        return x
    if drop_rate >= 1.0:
        return jnp.zeros_like(x)
    keep_prob = 1.0 - float(drop_rate)

    n = x.size
    rows = pl.cdiv(n, _LANE_COLS)
    tile_rows = min(_MAX_TILE_ROWS, _round_up(rows, 8))
    rows_pad = _round_up(rows, tile_rows)
    flat = x.reshape(-1)
    pad = rows_pad * _LANE_COLS - n
    if pad:
        flat = jnp.pad(flat, (0, pad))
    x2 = flat.reshape(rows_pad, _LANE_COLS)
    seed_arr = jnp.asarray([seed], dtype=jnp.int32)

    out2 = pl.pallas_call(
        functools.partial(
            _scalar_dropout_kernel,
            threshold=_threshold_u32(keep_prob),
            inv_keep=1.0 / keep_prob,
            salt=_SCALAR_SALT,
            col_shift=_LANE_SHIFT,
        ),
        out_shape=jax.ShapeDtypeStruct((rows_pad, _LANE_COLS), x.dtype),
        grid=(rows_pad // tile_rows,),
        in_specs=[
            pl.BlockSpec(memory_space=pltpu.MemorySpace.SMEM),          # seed scalar
            pl.BlockSpec((tile_rows, _LANE_COLS), lambda i: (i, 0)),    # row-tiled input
        ],
        out_specs=pl.BlockSpec((tile_rows, _LANE_COLS), lambda i: (i, 0)),
        compiler_params=pltpu.CompilerParams(dimension_semantics=("parallel",)),
    )(seed_arr, x2)
    return out2.reshape(-1)[:n].reshape(x.shape)


def vector_dropout(x, drop_rate, seed, training=True):
    """VectorDropout equivalent: mask over x.shape[:-1], broadcast on the last (coord) axis."""
    if (not training) or drop_rate <= 0.0 or x.size == 0:
        return x
    if drop_rate >= 1.0:
        return jnp.zeros_like(x)
    keep_prob = 1.0 - float(drop_rate)

    orig_shape = x.shape
    d = orig_shape[-1]                      # coordinate axis (3)
    m = x.size // d                         # number of (node, channel) vectors
    vt = x.reshape(m, d).T                  # (d, m): lane-dense channel axis last
    tile_cols = min(_VEC_TILE_COLS, _round_up(m, 128))
    m_pad = _round_up(m, tile_cols)
    if m_pad != m:
        vt = jnp.pad(vt, ((0, 0), (0, m_pad - m)))
    seed_arr = jnp.asarray([seed], dtype=jnp.int32)

    out = pl.pallas_call(
        functools.partial(
            _vector_dropout_kernel,
            threshold=_threshold_u32(keep_prob),
            inv_keep=1.0 / keep_prob,
            salt=_VECTOR_SALT,
        ),
        out_shape=jax.ShapeDtypeStruct((d, m_pad), x.dtype),
        grid=(m_pad // tile_cols,),
        in_specs=[
            pl.BlockSpec(memory_space=pltpu.MemorySpace.SMEM),          # seed scalar
            pl.BlockSpec((d, tile_cols), lambda i: (0, i)),             # column-tiled input
        ],
        out_specs=pl.BlockSpec((d, tile_cols), lambda i: (0, i)),
        compiler_params=pltpu.CompilerParams(dimension_semantics=("parallel",)),
    )(seed_arr, vt)
    return out[:, :m].T.reshape(orig_shape)


def gcp_dropout(x, drop_rate=0.1, use_gcp_dropout=True, training=True, seed=0):
    """GCPDropout.forward.

    `x` is either a single array (scalar channels only) or a tuple
    (scalar, vector) standing in for ScalarVector.
    """
    if not use_gcp_dropout:
        return x
    if isinstance(x, (tuple, list)):
        s, v = x
        if s.shape[0] == 0 or v.shape[0] == 0:
            return (s, v)
        # One shared seed; scalar/vector streams are decorrelated by distinct salts.
        return (
            scalar_dropout(s, drop_rate, seed, training),
            vector_dropout(v, drop_rate, seed, training),
        )
    if x.shape[0] == 0:
        return x
    return scalar_dropout(x, drop_rate, seed, training)


if __name__ == "__main__":
    key = jax.random.PRNGKey(0)
    k_s, k_v = jax.random.split(key)

    N, Cs, Cv = 8, 32, 16
    drop_rate = 0.25

    scalar_in = jax.random.normal(k_s, (N, Cs), dtype=jnp.float32)
    vector_in = jax.random.normal(k_v, (N, Cv, 3), dtype=jnp.float32)

    s_out, v_out = gcp_dropout(
        (scalar_in, vector_in), drop_rate=drop_rate, training=True, seed=1234
    )
    s_out = jax.block_until_ready(s_out)
    v_out = jax.block_until_ready(v_out)

    keep_prob = 1.0 - drop_rate

    # Survivors equal x / (1 - p); dropped entries are exactly 0.
    s_ok = bool(
        jnp.all(jnp.isclose(s_out, scalar_in / keep_prob, atol=1e-5) | (s_out == 0.0))
    )
    v_ok = bool(
        jnp.all(jnp.isclose(v_out, vector_in / keep_prob, atol=1e-5) | (v_out == 0.0))
    )
    # Vector mask must be constant along the coordinate axis.
    v_mask = v_out != 0.0
    v_consistent = bool(
        jnp.all(jnp.all(v_mask, axis=-1) | jnp.all(~v_mask, axis=-1))
    )
    # The mask should actually drop some and keep some elements.
    mixed = bool(jnp.any(s_out == 0.0)) and bool(jnp.any(s_out != 0.0))

    # Eval mode is identity.
    s_eval = gcp_dropout(scalar_in, drop_rate=drop_rate, training=False)
    eval_ok = bool(jnp.all(s_eval == scalar_in))

    assert s_ok and v_ok and v_consistent and mixed and eval_ok
    print("KERNEL_OK")
</pallas_src>

<mosaic_0001>
module attributes {stable_mosaic.version = 11 : i64} {
  func.func @_scalar_dropout_kernel(%arg0: i32, %arg1: memref<1xi32, #tpu.memory_space<smem>>, %arg2: memref<8x512xf32, #tpu.memory_space<vmem>>, %arg3: memref<8x512xf32, #tpu.memory_space<vmem>>) attributes {dimension_semantics = [#tpu.dimension_semantics<parallel>], iteration_bounds = array<i64: 1>, scalar_prefetch = 0 : i64, scratch_operands = 0 : i64, tpu.core_type = #tpu.core_type<tc>, window_params = [{transform_indices = @transform_0, window_bounds = array<i64: 1>}, {transform_indices = @transform_1, window_bounds = array<i64: 8, 512>}, {transform_indices = @transform_2, window_bounds = array<i64: 8, 512>}]} {
    %c0 = arith.constant 0 : index
    %0 = memref.load %arg1[%c0] : memref<1xi32, #tpu.memory_space<smem>>
    %c-1640531527_i32 = arith.constant -1640531527 : i32
    %1 = arith.xori %0, %c-1640531527_i32 : i32
    %c2127912214_i32 = arith.constant 2127912214 : i32
    %2 = arith.addi %1, %c2127912214_i32 : i32
    %c12_i32 = arith.constant 12 : i32
    %3 = arith.shli %1, %c12_i32 : i32
    %4 = arith.addi %2, %3 : i32
    %c-949894596_i32 = arith.constant -949894596 : i32
    %5 = arith.xori %4, %c-949894596_i32 : i32
    %c19_i32 = arith.constant 19 : i32
    %6 = arith.shrui %4, %c19_i32 : i32
    %7 = arith.xori %5, %6 : i32
    %c374761393_i32 = arith.constant 374761393 : i32
    %8 = arith.addi %7, %c374761393_i32 : i32
    %c5_i32 = arith.constant 5 : i32
    %9 = arith.shli %7, %c5_i32 : i32
    %10 = arith.addi %8, %9 : i32
    %c-744332180_i32 = arith.constant -744332180 : i32
    %11 = arith.addi %10, %c-744332180_i32 : i32
    %c9_i32 = arith.constant 9 : i32
    %12 = arith.shli %10, %c9_i32 : i32
    %13 = arith.xori %11, %12 : i32
    %c-42973499_i32 = arith.constant -42973499 : i32
    %14 = arith.addi %13, %c-42973499_i32 : i32
    %c3_i32 = arith.constant 3 : i32
    %15 = arith.shli %13, %c3_i32 : i32
    %16 = arith.addi %14, %15 : i32
    %c-1252372727_i32 = arith.constant -1252372727 : i32
    %17 = arith.xori %16, %c-1252372727_i32 : i32
    %c16_i32 = arith.constant 16 : i32
    %18 = arith.shrui %16, %c16_i32 : i32
    %19 = arith.xori %17, %18 : i32
    %c8_i32 = arith.constant 8 : i32
    %20 = arith.muli %arg0, %c8_i32 : i32
    %21 = tpu.iota {dimensions = array<i32: 0>} : vector<8x512xi32>
    %22 = tpu.iota {dimensions = array<i32: 1>} : vector<8x512xi32>
    %23 = vector.broadcast %20 : i32 to vector<8x512xi32>
    %24 = arith.addi %23, %21 : vector<8x512xi32>
    %c9_i32_0 = arith.constant 9 : i32
    %25 = vector.broadcast %c9_i32_0 : i32 to vector<8x512xi32>
    %26 = arith.shli %24, %25 : vector<8x512xi32>
    %27 = arith.addi %26, %22 : vector<8x512xi32>
    %28 = vector.broadcast %19 : i32 to vector<8x512xi32>
    %29 = arith.xori %27, %28 : vector<8x512xi32>
    %c2127912214_i32_1 = arith.constant 2127912214 : i32
    %30 = vector.broadcast %c2127912214_i32_1 : i32 to vector<8x512xi32>
    %31 = arith.addi %29, %30 : vector<8x512xi32>
    %c12_i32_2 = arith.constant 12 : i32
    %32 = vector.broadcast %c12_i32_2 : i32 to vector<8x512xi32>
    %33 = arith.shli %29, %32 : vector<8x512xi32>
    %34 = arith.addi %31, %33 : vector<8x512xi32>
    %c-949894596_i32_3 = arith.constant -949894596 : i32
    %35 = vector.broadcast %c-949894596_i32_3 : i32 to vector<8x512xi32>
    %36 = arith.xori %34, %35 : vector<8x512xi32>
    %c19_i32_4 = arith.constant 19 : i32
    %37 = vector.broadcast %c19_i32_4 : i32 to vector<8x512xi32>
    %38 = arith.shrui %34, %37 : vector<8x512xi32>
    %39 = arith.xori %36, %38 : vector<8x512xi32>
    %c374761393_i32_5 = arith.constant 374761393 : i32
    %40 = vector.broadcast %c374761393_i32_5 : i32 to vector<8x512xi32>
    %41 = arith.addi %39, %40 : vector<8x512xi32>
    %c5_i32_6 = arith.constant 5 : i32
    %42 = vector.broadcast %c5_i32_6 : i32 to vector<8x512xi32>
    %43 = arith.shli %39, %42 : vector<8x512xi32>
    %44 = arith.addi %41, %43 : vector<8x512xi32>
    %c-744332180_i32_7 = arith.constant -744332180 : i32
    %45 = vector.broadcast %c-744332180_i32_7 : i32 to vector<8x512xi32>
    %46 = arith.addi %44, %45 : vector<8x512xi32>
    %c9_i32_8 = arith.constant 9 : i32
    %47 = vector.broadcast %c9_i32_8 : i32 to vector<8x512xi32>
    %48 = arith.shli %44, %47 : vector<8x512xi32>
    %49 = arith.xori %46, %48 : vector<8x512xi32>
    %c-42973499_i32_9 = arith.constant -42973499 : i32
    %50 = vector.broadcast %c-42973499_i32_9 : i32 to vector<8x512xi32>
    %51 = arith.addi %49, %50 : vector<8x512xi32>
    %c3_i32_10 = arith.constant 3 : i32
    %52 = vector.broadcast %c3_i32_10 : i32 to vector<8x512xi32>
    %53 = arith.shli %49, %52 : vector<8x512xi32>
    %54 = arith.addi %51, %53 : vector<8x512xi32>
    %c-1252372727_i32_11 = arith.constant -1252372727 : i32
    %55 = vector.broadcast %c-1252372727_i32_11 : i32 to vector<8x512xi32>
    %56 = arith.xori %54, %55 : vector<8x512xi32>
    %c16_i32_12 = arith.constant 16 : i32
    %57 = vector.broadcast %c16_i32_12 : i32 to vector<8x512xi32>
    %58 = arith.shrui %54, %57 : vector<8x512xi32>
    %59 = arith.xori %56, %58 : vector<8x512xi32>
    %c-1073741824_i32 = arith.constant -1073741824 : i32
    %60 = vector.broadcast %c-1073741824_i32 : i32 to vector<8x512xi32>
    %61 = arith.cmpi ult, %59, %60 : vector<8x512xi32>
    %c0_13 = arith.constant 0 : index
    %c0_14 = arith.constant 0 : index
    %62 = vector.load %arg2[%c0_13, %c0_14] : memref<8x512xf32, #tpu.memory_space<vmem>>, vector<8x512xf32>
    %cst = arith.constant 1.33333337 : f32
    %63 = vector.broadcast %cst : f32 to vector<8x512xf32>
    %64 = arith.mulf %62, %63 : vector<8x512xf32>
    %cst_15 = arith.constant 0.000000e+00 : f32
    %65 = vector.broadcast %cst_15 : f32 to vector<8x512xf32>
    %66 = arith.select %61, %64, %65 : vector<8x512xi1>, vector<8x512xf32>
    %c0_16 = arith.constant 0 : index
    %c0_17 = arith.constant 0 : index
    %67 = vector.load %arg3[%c0_16, %c0_17] : memref<8x512xf32, #tpu.memory_space<vmem>>, vector<8x512xf32>
    tpu.vector_store %arg3[%c0_16, %c0_17], %66 {strides = array<i32>} : memref<8x512xf32, #tpu.memory_space<vmem>>, vector<8x512xf32>,
    return
  }
  func.func @transform_0(%arg0: i32) -> i32 {
    %c0_i32 = arith.constant 0 : i32
    %c0_i32_0 = arith.constant 0 : i32
    return %c0_i32 : i32
  }
  func.func @transform_1(%arg0: i32) -> (i32, i32) {
    %c0_i32 = arith.constant 0 : i32
    %c0_i32_0 = arith.constant 0 : i32
    return %arg0, %c0_i32 : i32, i32
  }
  func.func @transform_2(%arg0: i32) -> (i32, i32) {
    %c0_i32 = arith.constant 0 : i32
    %c0_i32_0 = arith.constant 0 : i32
    return %arg0, %c0_i32 : i32, i32
  }
}

</mosaic_0001>

<bundles_post_ra>
// kernel: tpu_custom_call.1
= control target key start
LH: loop header
LB: loop body
LE: loop exit
PB: predicated region body
PF: predicated region fallthrough
CT: control target
= control target key end

     0   :  { %8 = vsyncpa [#allocation4], 0  ;;  %s266_s0 = inlined_call_operand.<no memory space> [shape: s32[1], index: 0, kind: input, shape index: {}]   ;;  %s267_s1 = inlined_call_operand.hbm [shape: f32[8,512], index: 1, kind: input, shape index: {}]   ;;  %s268_s2 = inlined_call_operand.hbm [shape: f32[8,512], index: 2, kind: output, shape index: {}]  }
   0x1   :  { %9 = vsyncpa [#allocation5], 0  ;;  %s222_s9 = smov [#allocation3]   ;;  %s174_s13 = scalar_lea.hbm %s267_s1, 512 }
   0x2   :  { %s18_s10 = sshll.u32 %s222_s9, 4  ;;  %p175_p0 = scmp.ne.s32.totalorder %s267_s1, %s174_s13  ;;  %s19_s10 = int_to_ptr.vmem [resolvable:$true] %s18_s10 }
   0x3   :  { %p178_p1 = scmp.lt.u32.totalorder %s174_s13, %s267_s1 }
   0x5   :  { %p180_p2 = pnand %p178_p1, %p175_p0 }
   0x7   :  { %183 = shalt.err (!%p180_p2)
}
   0x8   :  { %s184_s18 = scalar_lea.vmem %s19_s10, 512  ;;  %p189_p4 = scmp.lt.s32.totalorder %s19_s10, %s19_s10 }
   0x9   :  { %p185_p3 = scmp.ne.s32.totalorder %s19_s10, %s184_s18  ;;  %p190_p5 = scmp.lt.s32.totalorder %s184_s18, %s184_s18 }
   0xb   :  { %p191_p6 = por %p190_p5, %p189_p4 }
   0xd   :  { %p192_p7 = pnand %p191_p6, %p185_p3 }
   0xf   :  { %195 = shalt.err (!%p192_p7)
}
  0x10   :  { %21 = dma.hbm_to_vmem [thread:$0]  %s267_s1, 512, %s19_s10, [#allocation4]  }
  0x11   :  { %218 = dma.done.wait [#allocation4], 512  }
  0x12   :  { %219 = vsyncadd [#allocation4], 4294966784  ;;  %s26_s23 = sxor.u32 2654435769, %s266_s0  ;;  %v46_v0 = vlaneseq  ;;  %v141_v62 = vld [vmem:[#allocation3] sm:$0xff]  ;;  %v142_v63 = vld [vmem:[#allocation3 + $0x8] sm:$0xff] }
  0x13   :  { %s27_s24 = sadd.s32 2127912214, %s26_s23  ;;  %s28_s25 = sshll.u32 %s26_s23, 12 }
  0x14   :  { %s29_s26 = sadd.s32 %s28_s25, %s27_s24  ;;  %v47_v1 = vshrl.u32 %v46_v0, 7  ;;  %v49_v2 = vand.u32 127, %v46_v0  ;;  %s223_s12 = smov [#allocation6]  }
  0x15   :  { %s30_s27 = sxor.u32 3345072700, %s29_s26  ;;  %s31_s28 = sshrl.u32 %s29_s26, 19 }
  0x16   :  { %s32_s29 = sxor.u32 %s31_s28, %s30_s27  ;;  %v55_v3 = vshll.u32 %v47_v1, 9  ;;  %v50_v4 = vadd.s32 128, %v49_v2  ;;  %v51_v5 = vadd.s32 256, %v49_v2  ;;  %v52_v6 = vadd.s32 384, %v49_v2  ;;  %s163_s13 = sshll.u32 %s223_s12, 4  ;;  %s164_s13 = int_to_ptr.vmem [resolvable:$true] %s163_s13 }
  0x17   :  { %s33_s30 = sadd.s32 374761393, %s32_s29  ;;  %s34_s3 = sshll.u32 %s32_s29, 5 }
  0x18   :  { %s35_s4 = sadd.s32 %s34_s3, %s33_s30  ;;  %v56_v7 = vadd.s32 %v55_v3, %v49_v2  ;;  %v57_v8 = vadd.s32 %v55_v3, %v50_v4  ;;  %v58_v9 = vadd.s32 %v55_v3, %v51_v5  ;;  %v59_v10 = vadd.s32 %v55_v3, %v52_v6  ;;  %s196_s14 = scalar_lea.vmem %s164_s13, 512 }
  0x19   :  { %s36_s1 = sadd.s32 3550635116, %s35_s4  ;;  %s37_s5 = sshll.u32 %s35_s4, 9 }
  0x1a   :  { %s38_s6 = sxor.u32 %s37_s5, %s36_s1  ;;  %p197_p8 = scmp.ne.s32.totalorder %s164_s13, %s196_s14 }
  0x1b   :  { %s39_s0 = sadd.s32 4251993797, %s38_s6  ;;  %s40_s7 = sshll.u32 %s38_s6, 3 }
  0x1c   :  { %s41_s8 = sadd.s32 %s40_s7, %s39_s0  ;;  %p201_p9 = scmp.lt.s32.totalorder %s164_s13, %s164_s13 }
  0x1d   :  { %s42_s9 = sxor.u32 3042594569, %s41_s8  ;;  %s43_s10 = sshrl.u32 %s41_s8, 16 }
  0x1e   :  { %s44_s11 = sxor.u32 %s43_s10, %s42_s9  ;;  %p202_p10 = scmp.lt.s32.totalorder %s196_s14, %s196_s14 }
  0x1f   :  { %v60_v11 = vstv %s44_s11 }
  0x20   :  { %v61_v12 = vxor.u32 %v60_v11, %v56_v7  ;;  %v62_v13 = vxor.u32 %v60_v11, %v57_v8  ;;  %v63_v14 = vxor.u32 %v60_v11, %v58_v9  ;;  %v64_v15 = vxor.u32 %v60_v11, %v59_v10  ;;  %p203_p11 = por %p202_p10, %p201_p9 }
  0x22   :  { %v65_v16 = vadd.s32 2127912214, %v61_v12  ;;  %v69_v17 = vshll.u32 %v61_v12, 12  ;;  %v66_v18 = vadd.s32 2127912214, %v62_v13  ;;  %v70_v19 = vshll.u32 %v62_v13, 12  ;;  %p204_p12 = pnand %p203_p11, %p197_p8 }
  0x23   :  { %v67_v20 = vadd.s32 2127912214, %v63_v14  ;;  %v71_v21 = vshll.u32 %v63_v14, 12  ;;  %v68_v22 = vadd.s32 2127912214, %v64_v15  ;;  %v72_v23 = vshll.u32 %v64_v15, 12 }
  0x24   :  { %v73_v24 = vadd.s32 %v69_v17, %v65_v16  ;;  %v74_v25 = vadd.s32 %v70_v19, %v66_v18  ;;  %v145_v12 = vmul.f32 1.3333334, %v141_v62  ;;  %v146_v13 = vmul.f32 1.3333334, %v142_v63  ;;  %v143_v15 = vld [vmem:[#allocation3 + $0x10] sm:$0xff]  ;;  %v144_v17 = vld [vmem:[#allocation3 + $0x18] sm:$0xff] }
  0x25   :  { %v75_v26 = vadd.s32 %v71_v21, %v67_v20  ;;  %v76_v27 = vadd.s32 %v72_v23, %v68_v22 }
  0x26   :  { %v77_v28 = vxor.u32 3345072700, %v73_v24  ;;  %v81_v29 = vshrl.u32 %v73_v24, 19  ;;  %v78_v30 = vxor.u32 3345072700, %v74_v25  ;;  %v82_v31 = vshrl.u32 %v74_v25, 19 }
  0x27   :  { %v79_v32 = vxor.u32 3345072700, %v75_v26  ;;  %v83_v33 = vshrl.u32 %v75_v26, 19  ;;  %v80_v34 = vxor.u32 3345072700, %v76_v27  ;;  %v84_v35 = vshrl.u32 %v76_v27, 19 }
  0x28   :  { %v85_v36 = vxor.u32 %v81_v29, %v77_v28  ;;  %v86_v37 = vxor.u32 %v82_v31, %v78_v30  ;;  %v147_v28 = vmul.f32 1.3333334, %v143_v15  ;;  %v148_v29 = vmul.f32 1.3333334, %v144_v17 }
  0x29   :  { %v87_v38 = vxor.u32 %v83_v33, %v79_v32  ;;  %v88_v39 = vxor.u32 %v84_v35, %v80_v34 }
  0x2a   :  { %v89_v40 = vadd.s32 374761393, %v85_v36  ;;  %v93_v41 = vshll.u32 %v85_v36, 5  ;;  %v90_v42 = vadd.s32 374761393, %v86_v37  ;;  %v94_v43 = vshll.u32 %v86_v37, 5 }
  0x2b   :  { %v91_v44 = vadd.s32 374761393, %v87_v38  ;;  %v95_v45 = vshll.u32 %v87_v38, 5  ;;  %v92_v46 = vadd.s32 374761393, %v88_v39  ;;  %v96_v47 = vshll.u32 %v88_v39, 5 }
  0x2c   :  { %v97_v48 = vadd.s32 %v93_v41, %v89_v40  ;;  %v98_v49 = vadd.s32 %v94_v43, %v90_v42 }
  0x2d   :  { %v99_v50 = vadd.s32 %v95_v45, %v91_v44  ;;  %v100_v51 = vadd.s32 %v96_v47, %v92_v46 }
  0x2e   :  { %v101_v52 = vadd.s32 3550635116, %v97_v48  ;;  %v105_v53 = vshll.u32 %v97_v48, 9  ;;  %v102_v54 = vadd.s32 3550635116, %v98_v49  ;;  %v106_v55 = vshll.u32 %v98_v49, 9 }
  0x2f   :  { %v103_v56 = vadd.s32 3550635116, %v99_v50  ;;  %v107_v57 = vshll.u32 %v99_v50, 9  ;;  %v104_v58 = vadd.s32 3550635116, %v100_v51  ;;  %v108_v59 = vshll.u32 %v100_v51, 9 }
  0x30   :  { %v109_v60 = vxor.u32 %v105_v53, %v101_v52  ;;  %v110_v61 = vxor.u32 %v106_v55, %v102_v54 }
  0x31   :  { %v111_v0 = vxor.u32 %v107_v57, %v103_v56  ;;  %v112_v1 = vxor.u32 %v108_v59, %v104_v58 }
  0x32   :  { %v113_v2 = vadd.s32 4251993797, %v109_v60  ;;  %v117_v3 = vshll.u32 %v109_v60, 3  ;;  %v114_v4 = vadd.s32 4251993797, %v110_v61  ;;  %v118_v5 = vshll.u32 %v110_v61, 3 }
  0x33   :  { %v115_v6 = vadd.s32 4251993797, %v111_v0  ;;  %v119_v7 = vshll.u32 %v111_v0, 3  ;;  %v116_v8 = vadd.s32 4251993797, %v112_v1  ;;  %v120_v9 = vshll.u32 %v112_v1, 3 }
  0x34   :  { %v121_v10 = vadd.s32 %v117_v3, %v113_v2  ;;  %v122_v11 = vadd.s32 %v118_v5, %v114_v4 }
  0x35   :  { %v123_v14 = vadd.s32 %v119_v7, %v115_v6  ;;  %v124_v16 = vadd.s32 %v120_v9, %v116_v8 }
  0x36   :  { %v125_v18 = vxor.u32 3042594569, %v121_v10  ;;  %v129_v19 = vshrl.u32 %v121_v10, 16  ;;  %v126_v20 = vxor.u32 3042594569, %v122_v11  ;;  %v130_v21 = vshrl.u32 %v122_v11, 16 }
  0x37   :  { %v127_v22 = vxor.u32 3042594569, %v123_v14  ;;  %v131_v23 = vshrl.u32 %v123_v14, 16  ;;  %v128_v24 = vxor.u32 3042594569, %v124_v16  ;;  %v132_v25 = vshrl.u32 %v124_v16, 16 }
  0x38   :  { %v133_v26 = vxor.u32 %v129_v19, %v125_v18  ;;  %v134_v27 = vxor.u32 %v130_v21, %v126_v20 }
  0x39   :  { %v135_v30 = vxor.u32 %v131_v23, %v127_v22  ;;  %v136_v31 = vxor.u32 %v132_v25, %v128_v24 }
  0x3a   :  { %vm137_vm0 = vcmp.lt.u32.totalorder %v133_v26, 3221225472  ;;  %vm138_vm1 = vcmp.lt.u32.totalorder %v134_v27, 3221225472 }
  0x3b   :  { %v149_v32 = vsel %vm137_vm0, %v145_v12, 0.0  ;;  %v150_v33 = vsel %vm138_vm1, %v146_v13, 0.0  ;;  %vm139_vm2 = vcmp.lt.u32.totalorder %v135_v30, 3221225472  ;;  %vm140_vm3 = vcmp.lt.u32.totalorder %v136_v31, 3221225472 }
  0x3c   :  { %153 = vst [vmem:[#allocation6] sm:$0xff] %v149_v32  ;;  %154 = vst [vmem:[#allocation6 + $0x8] sm:$0xff] %v150_v33  ;;  %v151_v34 = vsel %vm139_vm2, %v147_v28, 0.0  ;;  %v152_v35 = vsel %vm140_vm3, %v148_v29, 0.0 }
  0x3d   :  { %155 = vst [vmem:[#allocation6 + $0x10] sm:$0xff] %v151_v34  ;;  %156 = vst [vmem:[#allocation6 + $0x18] sm:$0xff] %v152_v35 }
  0x3e   :  { %207 = shalt.err (!%p204_p12)
}
  0x3f   :  { %s208_s17 = scalar_lea.hbm %s268_s2, 512 }
  0x40   :  { %p209_p13 = scmp.ne.s32.totalorder %s268_s2, %s208_s17  ;;  %p212_p0 = scmp.lt.u32.totalorder %s208_s17, %s268_s2 }
  0x42   :  { %p214_p1 = pnand %p212_p0, %p209_p13 }
  0x44   :  { %217 = shalt.err (!%p214_p1)
}
  0x45   :  { %166 = dma.vmem_to_hbm [thread:$0]  %s164_s13, 512, %s268_s2, [#allocation5]  }
  0x46   :  { %220 = dma.done.wait [#allocation5], 512  }
  0x47   :  { %221 = vsyncadd [#allocation5], 4294966784 }
  0x48   :  { %170 = vsyncpa [#allocation4], 1 }
  0x49   :  { %171 = vsyncpa [#allocation5], 1 }

</bundles_post_ra>
